<compile_context>
chip_gen: v6e
topology: v6e:2x2x1
jax: 0.10.0
libtpu: 0.0.40
codegen_flags: <defaults>
</compile_context>

<pallas_src>
import functools

import jax
import jax.numpy as jnp
from jax.experimental import pallas as pl
from jax.experimental.pallas import tpu as pltpu


def _attn_pool_kernel(x_ref, w1t_ref, b1_ref, w2_ref, b2_ref, o_ref,
                      m_ref, l_ref, acc_ref, *, num_slices, mask_slices):
    """One (batch-tile, slice-tile) grid step of attention pooling.

    x_ref   : (tB, tS, D)  input tile
    w1t_ref : (D, H)       first Linear weight, pre-transposed (resident)
    b1_ref  : (1, H)
    w2_ref  : (1, H)       second Linear weight (out_features == 1)
    b2_ref  : (1, 1)
    o_ref   : (tB, D)      pooled output for this batch tile
    m/l/acc : online-softmax running max / denominator / weighted sum of x
    """
    s = pl.program_id(1)

    @pl.when(s == 0)
    def _init():
        m_ref[...] = jnp.full_like(m_ref, -jnp.inf)
        l_ref[...] = jnp.zeros_like(l_ref)
        acc_ref[...] = jnp.zeros_like(acc_ref)

    x = x_ref[...]                                  # (tB, tS, D)
    tB, tS, D = x.shape

    if mask_slices:
        # cdiv remainder tile: zero padded slices so garbage VMEM never
        # reaches the MXU (0 * inf would NaN-pollute valid batch rows).
        slice_idx = s * tS + jax.lax.broadcasted_iota(jnp.int32, (tB, tS), 1)
        valid = slice_idx < num_slices
        x = jnp.where(valid[:, :, None], x, jnp.zeros_like(x))

    # hidden = GELU(x @ W1^T + b1), batch folded into the MXU M dimension.
    x2 = x.reshape(tB * tS, D)
    h = jnp.dot(x2, w1t_ref[...], preferred_element_type=jnp.float32)
    h = h + b1_ref[...].astype(jnp.float32)
    # TODO(synk): torch nn.GELU() defaults to the exact erf form; the tanh
    # approximation is used here (~1e-3 logit difference, renormalized by
    # the softmax) because erf has no guaranteed Mosaic lowering.
    h = jax.nn.gelu(h, approximate=True)            # (tB*tS, H) f32

    # logits over the slice axis: VPU multiply + lane reduce -> (tB, tS).
    h3 = h.reshape(tB, tS, -1)
    logits = jnp.sum(h3 * w2_ref[...].astype(jnp.float32), axis=-1)
    logits = logits + b2_ref[...].astype(jnp.float32)
    if mask_slices:
        logits = jnp.where(valid, logits, -jnp.inf)

    # Online softmax over slices fused with the weighted sum of x.
    m_prev = m_ref[...]                                            # (tB, 1)
    m_new = jnp.maximum(m_prev, jnp.max(logits, axis=1, keepdims=True))
    alpha = jnp.exp(m_prev - m_new)                                # (tB, 1)
    p = jnp.exp(logits - m_new)                                    # (tB, tS)
    l_ref[...] = alpha * l_ref[...] + jnp.sum(p, axis=1, keepdims=True)

    # Weighted sum of x on the MXU (f32 accumulation); keeps the VALU free and
    # avoids a full-tile f32 cast of x when x is bf16.
    p3 = p.reshape(tB, 1, tS).astype(x.dtype)
    contrib = jnp.einsum('bqs,bsd->bqd', p3, x,
                         preferred_element_type=jnp.float32)        # (tB,1,D)
    acc_ref[...] = alpha * acc_ref[...] + contrib[:, 0, :]
    m_ref[...] = m_new

    @pl.when(s == pl.num_programs(1) - 1)
    def _finalize():
        inv_l = pl.reciprocal(l_ref[...], approx=True)              # EUP slot
        o_ref[...] = (acc_ref[...] * inv_l).astype(o_ref.dtype)


def _choose_tiles(B, S, D, itemsize, target_bytes=4 << 20, max_tb=256):
    """Pick (tB, tS) so the per-step x tile is ~2-8 MiB, the MXU M dim (tB*tS)
    is as large as possible, and the double-buffered footprint stays well
    inside every generation's VMEM (v7x: 64 MiB physical)."""
    row = D * itemsize                        # bytes of one slice row
    total = B * S * row
    if total <= target_bytes and B <= max_tb:
        if B >= 2 and total > (1 << 20):
            # Big enough to be worth feeding both v7x TensorCores.
            return pl.cdiv(B, 2), S
        return B, S                           # tiny problem: single grid step
    per_batch = S * row
    if per_batch <= target_bytes:
        tB = max(1, min(B, target_bytes // per_batch, max_tb))
        return int(tB), S
    # One batch row per step; tile the slice axis in multiples of 8.
    tS = max(8, (target_bytes // row) // 8 * 8)
    return 1, int(min(tS, S))


@jax.jit
def attention_forward(x, w1, b1, w2, b2):
    """x: (B, S, D); w1: (H, D); b1: (H,); w2: (1, H); b2: (1,).
    Returns (B, D), matching AttentionModule.forward."""
    B, S, D = x.shape
    H = w1.shape[0]
    itemsize = x.dtype.itemsize

    tB, tS = _choose_tiles(B, S, D, itemsize)
    grid = (pl.cdiv(B, tB), pl.cdiv(S, tS))
    mask_slices = (S % tS) != 0

    # One-time XLA-side transpose so the resident weight is contracted
    # lhs-last / rhs-first on the MXU with no per-step XLU transpose.
    w1t = w1.T                                # (D, H)
    b1_2d = b1.reshape(1, H)
    w2_2d = w2.reshape(1, H)
    b2_2d = b2.reshape(1, 1)

    # VMEM budget: double-buffered x + output, resident weights, scratch.
    # Lane padding to 128 accounted for; 2x headroom; capped under v7x's
    # 64 MiB physical VMEM (well above v5e/v6e scoped defaults of 16/32 MiB).
    lanes = lambda n: max(n, 128)
    x_tile = tB * tS * lanes(D) * itemsize
    out_tile = tB * lanes(D) * itemsize
    w_resident = lanes(D) * lanes(H) * w1t.dtype.itemsize + 3 * lanes(H) * 4
    scratch = tB * (2 * 128 + lanes(D)) * 4
    needed = 2 * (x_tile + out_tile + w_resident) + scratch
    vmem_limit = int(min(max(2 * needed, 32 << 20), 56 << 20))

    kernel = functools.partial(_attn_pool_kernel,
                               num_slices=S, mask_slices=mask_slices)

    return pl.pallas_call(
        kernel,
        out_shape=jax.ShapeDtypeStruct((B, D), x.dtype),
        grid=grid,
        in_specs=[
            pl.BlockSpec((tB, tS, D), lambda b, s: (b, s, 0)),   # x tile
            pl.BlockSpec((D, H), lambda b, s: (0, 0)),           # W1^T resident
            pl.BlockSpec((1, H), lambda b, s: (0, 0)),           # b1
            pl.BlockSpec((1, H), lambda b, s: (0, 0)),           # W2
            pl.BlockSpec((1, 1), lambda b, s: (0, 0)),           # b2
        ],
        out_specs=pl.BlockSpec((tB, D), lambda b, s: (b, 0)),
        scratch_shapes=[
            pltpu.VMEM((tB, 1), jnp.float32),   # running max
            pltpu.VMEM((tB, 1), jnp.float32),   # running softmax denominator
            pltpu.VMEM((tB, D), jnp.float32),   # running weighted sum of x
        ],
        compiler_params=pltpu.CompilerParams(
            dimension_semantics=("parallel", "arbitrary"),
            vmem_limit_bytes=vmem_limit),
    )(x, w1t, b1_2d, w2_2d, b2_2d)


def attention_ref(x, w1, b1, w2, b2):
    """Pure-JAX reference of the same semantics (tanh-GELU, like the kernel)."""
    hp = jax.lax.Precision.HIGHEST
    h = jax.nn.gelu(jnp.einsum("bsd,hd->bsh", x, w1, precision=hp) + b1,
                    approximate=True)
    logits = jnp.einsum("bsh,oh->bso", h, w2, precision=hp) + b2
    weights = jax.nn.softmax(logits, axis=1)
    return jnp.sum(weights * x, axis=1)


def init_params(key, feature_dim, hidden_dim):
    """Mirror nn.Linear default init: U(-1/sqrt(fan_in), 1/sqrt(fan_in))."""
    k1, k2, k3, k4 = jax.random.split(key, 4)
    bound1 = 1.0 / jnp.sqrt(jnp.float32(feature_dim))
    w1 = jax.random.uniform(k1, (hidden_dim, feature_dim), jnp.float32,
                            minval=-bound1, maxval=bound1)
    b1 = jax.random.uniform(k2, (hidden_dim,), jnp.float32,
                            minval=-bound1, maxval=bound1)
    bound2 = 1.0 / jnp.sqrt(jnp.float32(hidden_dim))
    w2 = jax.random.uniform(k3, (1, hidden_dim), jnp.float32,
                            minval=-bound2, maxval=bound2)
    b2 = jax.random.uniform(k4, (1,), jnp.float32,
                            minval=-bound2, maxval=bound2)
    return w1, b1, w2, b2


if __name__ == "__main__":
    # Small shapes consistent with the module: batch=2, num_slices=8,
    # feature_dim=16, hidden_dim=32.
    batch, num_slices, feature_dim, hidden_dim = 2, 8, 16, 32

    key = jax.random.PRNGKey(0)
    k_x, k_p = jax.random.split(key)
    x = jax.random.normal(k_x, (batch, num_slices, feature_dim), jnp.float32)
    w1, b1, w2, b2 = init_params(k_p, feature_dim, hidden_dim)

    out = attention_forward(x, w1, b1, w2, b2)
    out = jax.block_until_ready(out)

    ref = attention_ref(x, w1, b1, w2, b2)
    assert out.shape == (batch, feature_dim)
    # Tolerance 2e-3 covers the approximate (EUP) reciprocal in the finalize.
    assert jnp.allclose(out, ref, atol=2e-3, rtol=2e-3), (
        "max abs err = %f" % float(jnp.max(jnp.abs(out - ref))))

    print("KERNEL_OK")
</pallas_src>

<mosaic_0001>
module attributes {stable_mosaic.version = 11 : i64} {
  func.func @_attn_pool_kernel(%arg0: i32, %arg1: i32, %arg2: memref<2x8x16xf32, #tpu.memory_space<vmem>>, %arg3: memref<16x32xf32, #tpu.memory_space<vmem>>, %arg4: memref<1x32xf32, #tpu.memory_space<vmem>>, %arg5: memref<1x32xf32, #tpu.memory_space<vmem>>, %arg6: memref<1x1xf32, #tpu.memory_space<vmem>>, %arg7: memref<2x16xf32, #tpu.memory_space<vmem>>, %arg8: memref<2x1xf32, #tpu.memory_space<vmem>>, %arg9: memref<2x1xf32, #tpu.memory_space<vmem>>, %arg10: memref<2x16xf32, #tpu.memory_space<vmem>>) attributes {dimension_semantics = [#tpu.dimension_semantics<parallel>, #tpu.dimension_semantics<arbitrary>], iteration_bounds = array<i64: 1, 1>, scalar_prefetch = 0 : i64, scratch_operands = 3 : i64, tpu.core_type = #tpu.core_type<tc>, window_params = [{transform_indices = @transform_0, window_bounds = array<i64: 2, 8, 16>}, {pipeline_mode = #tpu.pipeline_mode<synchronous>, transform_indices = @transform_1, window_bounds = array<i64: 16, 32>}, {pipeline_mode = #tpu.pipeline_mode<synchronous>, transform_indices = @transform_2, window_bounds = array<i64: 1, 32>}, {pipeline_mode = #tpu.pipeline_mode<synchronous>, transform_indices = @transform_3, window_bounds = array<i64: 1, 32>}, {pipeline_mode = #tpu.pipeline_mode<synchronous>, transform_indices = @transform_4, window_bounds = array<i64: 1, 1>}, {transform_indices = @transform_5, window_bounds = array<i64: 2, 16>}]} {
    %c0_i32 = arith.constant 0 : i32
    %0 = arith.cmpi eq, %arg1, %c0_i32 : i32
    %1 = arith.extui %0 : i1 to i32
    %c0_i32_0 = arith.constant 0 : i32
    %2 = arith.cmpi ne, %1, %c0_i32_0 : i32
    scf.if %2 {
      %cst_33 = arith.constant 0xFF800000 : f32
      %59 = vector.broadcast %cst_33 : f32 to vector<2x1xf32>
      %c0_34 = arith.constant 0 : index
      %c0_35 = arith.constant 0 : index
      %60 = vector.load %arg8[%c0_34, %c0_35] : memref<2x1xf32, #tpu.memory_space<vmem>>, vector<2x1xf32>
      tpu.vector_store %arg8[%c0_34, %c0_35], %59 {strides = array<i32>} : memref<2x1xf32, #tpu.memory_space<vmem>>, vector<2x1xf32>,
      %cst_36 = arith.constant 0.000000e+00 : f32
      %61 = vector.broadcast %cst_36 : f32 to vector<2x1xf32>
      %c0_37 = arith.constant 0 : index
      %c0_38 = arith.constant 0 : index
      %62 = vector.load %arg9[%c0_37, %c0_38] : memref<2x1xf32, #tpu.memory_space<vmem>>, vector<2x1xf32>
      tpu.vector_store %arg9[%c0_37, %c0_38], %61 {strides = array<i32>} : memref<2x1xf32, #tpu.memory_space<vmem>>, vector<2x1xf32>,
      %cst_39 = arith.constant 0.000000e+00 : f32
      %63 = vector.broadcast %cst_39 : f32 to vector<2x16xf32>
      %c0_40 = arith.constant 0 : index
      %c0_41 = arith.constant 0 : index
      %64 = vector.load %arg10[%c0_40, %c0_41] : memref<2x16xf32, #tpu.memory_space<vmem>>, vector<2x16xf32>
      tpu.vector_store %arg10[%c0_40, %c0_41], %63 {strides = array<i32>} : memref<2x16xf32, #tpu.memory_space<vmem>>, vector<2x16xf32>,
    } else {
    }
    %c0 = arith.constant 0 : index
    %c0_1 = arith.constant 0 : index
    %c0_2 = arith.constant 0 : index
    %3 = vector.load %arg2[%c0, %c0_1, %c0_2] : memref<2x8x16xf32, #tpu.memory_space<vmem>>, vector<2x8x16xf32>
    %4 = vector.shape_cast %3 : vector<2x8x16xf32> to vector<16x16xf32>
    %c0_3 = arith.constant 0 : index
    %c0_4 = arith.constant 0 : index
    %5 = vector.load %arg3[%c0_3, %c0_4] : memref<16x32xf32, #tpu.memory_space<vmem>>, vector<16x32xf32>
    %cst = arith.constant dense<0.000000e+00> : vector<16x32xf32>
    %6 = tpu.matmul %4, %5, %cst {dimension_numbers = #tpu.dot_dimension_numbers<[1], [0], [0], [1], [0, 0, 1, 1], [], []>} : vector<16x16xf32>, vector<16x32xf32>, vector<16x32xf32> -> vector<16x32xf32>
    %c0_5 = arith.constant 0 : index
    %c0_6 = arith.constant 0 : index
    %7 = vector.load %arg4[%c0_5, %c0_6] : memref<1x32xf32, #tpu.memory_space<vmem>>, vector<1x32xf32>
    %8 = vector.broadcast %7 : vector<1x32xf32> to vector<16x32xf32>
    %9 = arith.addf %6, %8 : vector<16x32xf32>
    %10 = arith.mulf %9, %9 : vector<16x32xf32>
    %11 = arith.mulf %9, %10 : vector<16x32xf32>
    %cst_7 = arith.constant 4.471500e-02 : f32
    %12 = vector.broadcast %cst_7 : f32 to vector<16x32xf32>
    %13 = arith.mulf %12, %11 : vector<16x32xf32>
    %14 = arith.addf %9, %13 : vector<16x32xf32>
    %cst_8 = arith.constant 0.797884583 : f32
    %15 = vector.broadcast %cst_8 : f32 to vector<16x32xf32>
    %16 = arith.mulf %15, %14 : vector<16x32xf32>
    %17 = math.tanh %16 : vector<16x32xf32>
    %cst_9 = arith.constant 1.000000e+00 : f32
    %18 = vector.broadcast %cst_9 : f32 to vector<16x32xf32>
    %19 = arith.addf %18, %17 : vector<16x32xf32>
    %cst_10 = arith.constant 5.000000e-01 : f32
    %20 = vector.broadcast %cst_10 : f32 to vector<16x32xf32>
    %21 = arith.mulf %20, %19 : vector<16x32xf32>
    %22 = arith.mulf %9, %21 : vector<16x32xf32>
    %23 = vector.shape_cast %22 : vector<16x32xf32> to vector<2x8x32xf32>
    %c0_11 = arith.constant 0 : index
    %c0_12 = arith.constant 0 : index
    %24 = vector.load %arg5[%c0_11, %c0_12] : memref<1x32xf32, #tpu.memory_space<vmem>>, vector<1x32xf32>
    %25 = vector.shape_cast %24 : vector<1x32xf32> to vector<1x1x32xf32>
    %26 = vector.broadcast %25 : vector<1x1x32xf32> to vector<2x8x32xf32>
    %27 = arith.mulf %23, %26 : vector<2x8x32xf32>
    %cst_13 = arith.constant dense<0.000000e+00> : vector<2x8xf32>
    %28 = vector.multi_reduction <add>, %27, %cst_13 [2] : vector<2x8x32xf32> to vector<2x8xf32>
    %c0_14 = arith.constant 0 : index
    %c0_15 = arith.constant 0 : index
    %29 = vector.load %arg6[%c0_14, %c0_15] : memref<1x1xf32, #tpu.memory_space<vmem>>, vector<1x1xf32>
    %30 = vector.broadcast %29 : vector<1x1xf32> to vector<2x8xf32>
    %31 = arith.addf %28, %30 : vector<2x8xf32>
    %c0_16 = arith.constant 0 : index
    %c0_17 = arith.constant 0 : index
    %32 = vector.load %arg8[%c0_16, %c0_17] : memref<2x1xf32, #tpu.memory_space<vmem>>, vector<2x1xf32>
    %cst_18 = arith.constant dense<0xFF800000> : vector<2xf32>
    %33 = vector.multi_reduction <maximumf>, %31, %cst_18 [1] : vector<2x8xf32> to vector<2xf32>
    %34 = vector.shape_cast %33 : vector<2xf32> to vector<2x1xf32>
    %35 = arith.maximumf %32, %34 : vector<2x1xf32>
    %36 = arith.subf %32, %35 : vector<2x1xf32>
    %37 = math.exp %36 : vector<2x1xf32>
    %38 = vector.broadcast %35 : vector<2x1xf32> to vector<2x8xf32>
    %39 = arith.subf %31, %38 : vector<2x8xf32>
    %40 = math.exp %39 : vector<2x8xf32>
    %c0_19 = arith.constant 0 : index
    %c0_20 = arith.constant 0 : index
    %41 = vector.load %arg9[%c0_19, %c0_20] : memref<2x1xf32, #tpu.memory_space<vmem>>, vector<2x1xf32>
    %42 = arith.mulf %37, %41 : vector<2x1xf32>
    %cst_21 = arith.constant dense<0.000000e+00> : vector<2xf32>
    %43 = vector.multi_reduction <add>, %40, %cst_21 [1] : vector<2x8xf32> to vector<2xf32>
    %44 = vector.shape_cast %43 : vector<2xf32> to vector<2x1xf32>
    %45 = arith.addf %42, %44 : vector<2x1xf32>
    %c0_22 = arith.constant 0 : index
    %c0_23 = arith.constant 0 : index
    %46 = vector.load %arg9[%c0_22, %c0_23] : memref<2x1xf32, #tpu.memory_space<vmem>>, vector<2x1xf32>
    tpu.vector_store %arg9[%c0_22, %c0_23], %45 {strides = array<i32>} : memref<2x1xf32, #tpu.memory_space<vmem>>, vector<2x1xf32>,
    %47 = vector.shape_cast %40 : vector<2x8xf32> to vector<2x1x8xf32>
    "tpu.trace_start"() <{level = 10 : i32, message = "bqs,bsd->bqd"}> : () -> ()
    %cst_24 = arith.constant dense<0.000000e+00> : vector<2x1x16xf32>
    %48 = tpu.matmul %47, %3, %cst_24 {dimension_numbers = #tpu.dot_dimension_numbers<[2], [1], [1], [2], [0, 0, 0, 1, 1, 2], [0], [0]>} : vector<2x1x8xf32>, vector<2x8x16xf32>, vector<2x1x16xf32> -> vector<2x1x16xf32>
    "tpu.trace_stop"() : () -> ()
    %c0_25 = arith.constant 0 : index
    %c0_26 = arith.constant 0 : index
    %49 = vector.load %arg10[%c0_25, %c0_26] : memref<2x16xf32, #tpu.memory_space<vmem>>, vector<2x16xf32>
    %50 = vector.broadcast %37 : vector<2x1xf32> to vector<2x16xf32>
    %51 = arith.mulf %50, %49 : vector<2x16xf32>
    %52 = vector.shape_cast %48 : vector<2x1x16xf32> to vector<2x16xf32>
    %53 = arith.addf %51, %52 : vector<2x16xf32>
    %c0_27 = arith.constant 0 : index
    %c0_28 = arith.constant 0 : index
    %54 = vector.load %arg10[%c0_27, %c0_28] : memref<2x16xf32, #tpu.memory_space<vmem>>, vector<2x16xf32>
    tpu.vector_store %arg10[%c0_27, %c0_28], %53 {strides = array<i32>} : memref<2x16xf32, #tpu.memory_space<vmem>>, vector<2x16xf32>,
    %c0_29 = arith.constant 0 : index
    %c0_30 = arith.constant 0 : index
    %55 = vector.load %arg8[%c0_29, %c0_30] : memref<2x1xf32, #tpu.memory_space<vmem>>, vector<2x1xf32>
    tpu.vector_store %arg8[%c0_29, %c0_30], %35 {strides = array<i32>} : memref<2x1xf32, #tpu.memory_space<vmem>>, vector<2x1xf32>,
    %c0_i32_31 = arith.constant 0 : i32
    %56 = arith.cmpi eq, %arg1, %c0_i32_31 : i32
    %57 = arith.extui %56 : i1 to i32
    %c0_i32_32 = arith.constant 0 : i32
    %58 = arith.cmpi ne, %57, %c0_i32_32 : i32
    scf.if %58 {
      %c0_33 = arith.constant 0 : index
      %c0_34 = arith.constant 0 : index
      %59 = vector.load %arg9[%c0_33, %c0_34] : memref<2x1xf32, #tpu.memory_space<vmem>>, vector<2x1xf32>
      %60 = tpu.reciprocal %59 {approx = true} : vector<2x1xf32> -> vector<2x1xf32>
      %c0_35 = arith.constant 0 : index
      %c0_36 = arith.constant 0 : index
      %61 = vector.load %arg10[%c0_35, %c0_36] : memref<2x16xf32, #tpu.memory_space<vmem>>, vector<2x16xf32>
      %62 = vector.broadcast %60 : vector<2x1xf32> to vector<2x16xf32>
      %63 = arith.mulf %61, %62 : vector<2x16xf32>
      %c0_37 = arith.constant 0 : index
      %c0_38 = arith.constant 0 : index
      %64 = vector.load %arg7[%c0_37, %c0_38] : memref<2x16xf32, #tpu.memory_space<vmem>>, vector<2x16xf32>
      tpu.vector_store %arg7[%c0_37, %c0_38], %63 {strides = array<i32>} : memref<2x16xf32, #tpu.memory_space<vmem>>, vector<2x16xf32>,
    } else {
    }
    return
  }
  func.func @transform_0(%arg0: i32, %arg1: i32) -> (i32, i32, i32) {
    %c0_i32 = arith.constant 0 : i32
    %c0_i32_0 = arith.constant 0 : i32
    return %arg0, %arg1, %c0_i32 : i32, i32, i32
  }
  func.func @transform_1(%arg0: i32, %arg1: i32) -> (i32, i32) {
    %c0_i32 = arith.constant 0 : i32
    %c0_i32_0 = arith.constant 0 : i32
    %c0_i32_1 = arith.constant 0 : i32
    return %c0_i32, %c0_i32_0 : i32, i32
  }
  func.func @transform_2(%arg0: i32, %arg1: i32) -> (i32, i32) {
    %c0_i32 = arith.constant 0 : i32
    %c0_i32_0 = arith.constant 0 : i32
    %c0_i32_1 = arith.constant 0 : i32
    return %c0_i32, %c0_i32_0 : i32, i32
  }
  func.func @transform_3(%arg0: i32, %arg1: i32) -> (i32, i32) {
    %c0_i32 = arith.constant 0 : i32
    %c0_i32_0 = arith.constant 0 : i32
    %c0_i32_1 = arith.constant 0 : i32
    return %c0_i32, %c0_i32_0 : i32, i32
  }
  func.func @transform_4(%arg0: i32, %arg1: i32) -> (i32, i32) {
    %c0_i32 = arith.constant 0 : i32
    %c0_i32_0 = arith.constant 0 : i32
    %c0_i32_1 = arith.constant 0 : i32
    return %c0_i32, %c0_i32_0 : i32, i32
  }
  func.func @transform_5(%arg0: i32, %arg1: i32) -> (i32, i32) {
    %c0_i32 = arith.constant 0 : i32
    %c0_i32_0 = arith.constant 0 : i32
    return %arg0, %c0_i32 : i32, i32
  }
}

</mosaic_0001>

<bundles_post_ra>
// kernel: attention_forward.1
= control target key start
LH: loop header
LB: loop body
LE: loop exit
PB: predicated region body
PF: predicated region fallthrough
CT: control target
= control target key end

     0   :  { %s659_s0 = inlined_call_operand.hbm [shape: f32[2,8,16], index: 0, kind: input, shape index: {}]   ;;  %s660_s1 = inlined_call_operand.hbm [shape: f32[16,32], index: 1, kind: input, shape index: {}]   ;;  %s661_s2 = inlined_call_operand.vmem [shape: f32[1,32], index: 2, kind: input, shape index: {}]   ;;  %s662_s3 = inlined_call_operand.vmem [shape: f32[1,32], index: 3, kind: input, shape index: {}]   ;;  %s663_s4 = inlined_call_operand.<no memory space> [shape: f32[1,1], index: 4, kind: input, shape index: {}]   ;;  %s664_s5 = inlined_call_operand.hbm [shape: f32[2,16], index: 5, kind: output, shape index: {}]  }
   0x1   :  { %v10_v0 = vstv %s663_s4 }
   0x2   :  { %11 = vst [vmem:[#allocation5] sm:$0x1] %v10_v0 }
   0x3   :  { %12 = vsyncpa [#allocation7], 0 }
   0x4   :  { %13 = vsyncpa [#allocation10], 0 }
   0x5   :  { %14 = vsyncpa [#allocation8], 0  ;;  %s580_s20 = smov [#allocation6]  }
   0x6   :  { %s20_s21 = sshll.u32 %s580_s20, 4  ;;  %s21_s21 = int_to_ptr.vmem [resolvable:$true] %s20_s21 }
   0x7   :  { %s522_s22 = scalar_lea.vmem %s21_s21, 256  ;;  %p527_p1 = scmp.lt.s32.totalorder %s21_s21, %s21_s21 }
   0x8   :  { %p523_p0 = scmp.ne.s32.totalorder %s21_s21, %s522_s22  ;;  %p528_p2 = scmp.lt.s32.totalorder %s522_s22, %s522_s22 }
   0xa   :  { %p529_p3 = por %p528_p2, %p527_p1 }
   0xc   :  { %p530_p4 = pnand %p529_p3, %p523_p0 }
   0xe   :  { %533 = shalt.err (!%p530_p4)
}
   0xf   :  { %s581_s23 = smov 128   ;;  %s582_s24 = smov 8  }
  0x10   :  { %26 = dma.hbm_to_vmem [thread:$0]  %s659_s0, 256, %s21_s21, [#allocation7], %s581_s23, %s581_s23, %s582_s24  }
  0x11   :  { %s583_s4 = smov [#allocation9]  }
  0x12   :  { %s32_s27 = sshll.u32 %s583_s4, 4  ;;  %s33_s27 = int_to_ptr.vmem [resolvable:$true] %s32_s27 }
  0x13   :  { %s542_s28 = scalar_lea.vmem %s33_s27, 256  ;;  %p547_p6 = scmp.lt.s32.totalorder %s33_s27, %s33_s27 }
  0x14   :  { %p543_p5 = scmp.ne.s32.totalorder %s33_s27, %s542_s28  ;;  %p548_p7 = scmp.lt.s32.totalorder %s542_s28, %s542_s28 }
  0x16   :  { %p549_p8 = por %p548_p7, %p547_p6 }
  0x18   :  { %p550_p9 = pnand %p549_p8, %p543_p5 }
  0x1a   :  { %553 = shalt.err (!%p550_p9)
}
  0x1b   :  { %38 = dma.hbm_to_vmem [thread:$0]  %s660_s1, 256, %s33_s27, [#allocation10], %s581_s23, %s581_s23, %s582_s24  }
  0x1c   :  { %574 = dma.done.wait [#allocation7], 256  }
  0x1d   :  { %575 = vsyncadd [#allocation7], 4294967040 }
  0x1e   :  { %576 = dma.done.wait [#allocation10], 256  }
  0x1f   :  { %577 = vsyncadd [#allocation10], 4294967040  ;;  %vm71_vm0 = vcmask 130048   ;;  %v63_v1 = vld [vmem:[#allocation9 + $0x8] sm:$0xff]  ;;  %v62_v2 = vld [vmem:[#allocation9] sm:$0xff]  ;;  %v584_v6 = vmov 0   ;;  %v202_v36 = vlaneseq }
  0x20   :  { %v628_v3 = vld [vmem:[#allocation6] sm:$0xff]  ;;  %474 = vmatprep.subr.mxu0 %v63_v1  ;;  %v631_v4 = vld [vmem:[#allocation6 + $0x8] sm:$0xff]  ;;  %v463_v5 = vld [vmem:[#allocation5] ss:$0 sm:$0xff]  ;;  %500 = vset.pattern.permute.xlu1 %v584_v6  ;;  %vm180_vm1 = vcmask 261120   ;;  %vm55_vm2 = vcmask 1024  }
  0x21   :  { %478 = vmatprep.mubr.msk.f32.mxu0 %vm71_vm0, %v628_v3  ;;  %475 = vmatpush3.msra.mxu0 %v63_v1  ;;  %v459_v7 = vld [vmem:[%s661_s2] ss:$0 sm:$0xff]  ;;  %v585_v35 = vmov -inf   ;;  %v203_v37 = vand.u32 127, %v202_v36  ;;  %v205_v38 = vshrl.u32 %v202_v36, 7  ;;  %vm212_vm3 = vcmask 1041409  }
  0x22   :  { %476 = vmatprep.subr.mxu0 %v62_v2  ;;  %501 = vset.pattern.permute.xlu0 %v584_v6  ;;  %v462_v30 = vld [vmem:[%s662_s3] ss:$0 sm:$0xff]  ;;  %56 = vst.msk [vmem:[#allocation2] sm:$0x3] %vm55_vm2, %v585_v35  ;;  %vm215_vm4 = vcmask 58368   ;;  %v586_v49 = vmov 0.0  }
  0x23   :  { %477 = vmatpush3.msra.mxu0 %v62_v2  ;;  %194 = vperm.xlu1 %500, %v463_v5   ;;  %v206_v41 = vsub.s32 %v203_v37, %v205_v38  ;;  %57 = vst.msk [vmem:[#allocation3] sm:$0x3] %vm55_vm2, %v586_v49  ;;  %v229_v54 = vsub.s32 0, %v205_v38  ;;  %v233_v55 = vsub.s32 1, %v205_v38  ;;  %vm58_vm5 = vcmask 123904   ;;  %s588_s3 = smov [#allocation11]  }
  0x24   :  { %479 = vmatmul.mubr.msk.f32.vlgmr.msra.gmra.mxu0 %vm71_vm0, %v631_v4  ;;  %481 = vmatprep.subr.mxu1 %v586_v49  ;;  %59 = vst.msk [vmem:[#allocation4] sm:$0x3] %vm58_vm5, %v586_v49  ;;  %vm587_vm6 = vmmov 0   ;;  %vm269_vm7 = vcmask 64512   ;;  %s449_s7 = sshll.u32 %s588_s3, 4  ;;  %s450_s7 = int_to_ptr.vmem [resolvable:$true] %s449_s7 }
  0x25   :  { %482 = vmatpush3.msra.mxu1 %v628_v3  ;;  %483 = vmatprep.mubr.msk.f32.mxu1 %vm587_vm6, %v586_v49  ;;  %s554_s8 = scalar_lea.vmem %s450_s7, 32  ;;  %p559_p11 = scmp.lt.s32.totalorder %s450_s7, %s450_s7 }
  0x26   :  { %486 = vmatprep.subr.mxu1 %v586_v49  ;;  %p555_p10 = scmp.ne.s32.totalorder %s450_s7, %s554_s8  ;;  %p560_p12 = scmp.lt.s32.totalorder %s554_s8, %s554_s8 }
  0x28   :  { %p561_p13 = por %p560_p12, %p559_p11 }
  0x29   :  { %v199_v50 = vld [vmem:[#allocation2] sm:$0x3] }
  0x2a   :  { %p562_p0 = pnand %p561_p13, %p555_p10 }
  0x9e   :  { %v195_v39 = vpop.permute.xlu1 %194 }
  0xe4   :  { %v480_v8 = vpop.f32.mrf.mxu0 }
  0xe5   :  { %v150_v9 = vadd.f32 %v480_v8, %v459_v7 }
  0xe6   :  { %v144_v10 = vpop.f32.mrf.mxu0 }
  0xe7   :  { %v154_v11 = vmul.f32 %v150_v9, %v150_v9  ;;  %v145_v12 = vadd.f32 %v459_v7, %v144_v10  ;;  %v243_v10 = vld [vmem:[#allocation3] sm:$0x3] }
  0xe9   :  { %v156_v13 = vmul.f32 %v154_v11, %v150_v9  ;;  %v153_v14 = vmul.f32 %v145_v12, %v145_v12 }
  0xeb   :  { %v158_v15 = vmul.f32 0.044715, %v156_v13  ;;  %v155_v16 = vmul.f32 %v153_v14, %v145_v12 }
  0xed   :  { %v160_v17 = vadd.f32 %v158_v15, %v150_v9  ;;  %v157_v18 = vmul.f32 0.044715, %v155_v16 }
  0xef   :  { %v162_v19 = vmul.f32 0.7978846, %v160_v17  ;;  %v159_v20 = vadd.f32 %v157_v18, %v145_v12  ;;  %v414_v18 = vld [vmem:[#allocation4] sm:$0x3] }
  0xf1   :  { %502 = vtanh.f32 %v162_v19  ;;  %v161_v21 = vmul.f32 0.7978846, %v159_v20 }
  0xf3   :  { %504 = vtanh.f32 %v161_v21 }
  0xfe   :  { %v503_v22 = vpop.eup %502 }
  0xff   :  { %v166_v23 = vadd.f32 1.0, %v503_v22 }
 0x100   :  { %v505_v24 = vpop.eup %504 }
 0x101   :  { %v165_v25 = vadd.f32 1.0, %v505_v24  ;;  %v168_v26 = vmul.f32 0.5, %v166_v23 }
 0x103   :  { %v167_v27 = vmul.f32 0.5, %v165_v25  ;;  %v170_v29 = vmul.f32 %v168_v26, %v150_v9 }
 0x105   :  { %v169_v28 = vmul.f32 %v167_v27, %v145_v12  ;;  %v179_v33 = vmul.f32 %v462_v30, %v170_v29 }
 0x107   :  { %v178_v31 = vmul.f32 %v462_v30, %v169_v28  ;;  %v184_v34 = vsel %vm180_vm1, %v179_v33, 0.0 }
 0x109   :  { %v181_v32 = vsel %vm180_vm1, %v178_v31, 0.0 }
 0x10a   :  { %182 = vadd.xlane.f32.xlu0 %v181_v32 }
 0x10e   :  { %185 = vadd.xlane.f32.xlu0 %v184_v34 }
 0x193   :  { %v183_v40 = vpop.xlane.xlu0 %182 }
 0x194   :  { %v197_v42 = vadd.f32 %v195_v39, %v183_v40 }
 0x196   :  { %v207_v45 = vrot.slane %v197_v42, %v206_v41 }
 0x197   :  { %v186_v43 = vpop.xlane.xlu0 %185 }
 0x198   :  { %v198_v44 = vadd.f32 %v195_v39, %v186_v43 }
 0x19a   :  { %v211_v46 = vrot.slane %v198_v44, %v206_v41 }
 0x19c   :  { %v213_v47 = vsel %vm212_vm3, %v211_v46, %v207_v45 }
 0x19d   :  { %v216_v48 = vsel %vm215_vm4, %v213_v47, -inf }
 0x19e   :  { %217 = vmax.xlane.f32.xlu1 %v216_v48 }
 0x227   :  { %v218_v51 = vpop.xlane.xlu1 %217 }
 0x228   :  { %v219_v52 = vmax.f32 %v199_v50, %v218_v51 }
 0x22a   :  { %v220_v53 = vsub.f32 %v199_v50, %v219_v52  ;;  %429 = vst.msk [vmem:[#allocation2] sm:$0x3] %vm55_vm2, %v219_v52  ;;  %225 = vperm.xlu0 %501, %v219_v52  }
 0x22c   :  { %v221_v63 = vmul.f32 1.442695, %v220_v53 }
 0x2a5   :  { %v226_v56 = vpop.permute.xlu0 %225 }
 0x2a6   :  { %v230_v57 = vrot.slane %v226_v56, %v229_v54  ;;  %v234_v58 = vrot.slane %v226_v56, %v233_v55 }
 0x2a8   :  { %v237_v59 = vsub.f32 %v197_v42, %v230_v57  ;;  %v238_v60 = vsub.f32 %v198_v44, %v234_v58 }
 0x2aa   :  { %v239_v61 = vmul.f32 1.442695, %v237_v59  ;;  %v241_v62 = vmul.f32 1.442695, %v238_v60 }
 0x2ac   :  { %506 = vpow2.f32 %v239_v61 }
 0x2ad   :  { %508 = vpow2.f32 %v241_v62 }
 0x2ae   :  { %510 = vpow2.f32 %v221_v63 }
 0x2b9   :  { %v507_v0 = vpop.eup %506 }
 0x2ba   :  { %v509_v1 = vpop.eup %508  ;;  %248 = vperm.xlu1 %500, %v507_v0  }
 0x2bb   :  { %251 = vperm.xlu0 %501, %v509_v1   ;;  %v511_v2 = vpop.eup %510 }
 0x2bc   :  { %v244_v11 = vmul.f32 %v511_v2, %v243_v10 }
 0x2be   :  { %417 = vperm.xlu1 %500, %v511_v2  }
 0x335   :  { %v249_v3 = vpop.permute.xlu1 %248 }
 0x336   :  { %v252_v5 = vpop.permute.xlu0 %251  ;;  %v256_v6 = vrot.slane %v249_v3, %v206_v41 }
 0x337   :  { %v260_v7 = vrot.slane %v252_v5, %v206_v41 }
 0x338   :  { %484 = vmatmul.mubr.msk.f32.vlgmr.msra.gmra.mxu1 %vm269_vm7, %v256_v6 }
 0x339   :  { %v261_v8 = vsel %vm212_vm3, %v260_v7, %v256_v6  ;;  %487 = vmatpush3.msra.mxu1 %v631_v4  ;;  %488 = vmatprep.mubr.msk.f32.mxu1 %vm587_vm6, %v586_v49  ;;  %v418_v4 = vpop.permute.xlu1 %417 }
 0x33a   :  { %v263_v9 = vsel %vm215_vm4, %v261_v8, 0.0  ;;  %v420_v21 = vmul.f32 %v418_v4, %v414_v18 }
 0x33b   :  { %264 = vadd.xlane.f32.xlu0 %v263_v9 }
 0x33c   :  { %489 = vmatmul.mubr.msk.f32.vlgmr.msra.gmra.mxu1 %vm269_vm7, %v260_v7 }
 0x3c4   :  { %v265_v12 = vpop.xlane.xlu0 %264 }
 0x3c5   :  { %v266_v13 = vadd.f32 %v265_v12, %v244_v11 }
 0x3c7   :  { %268 = vst.msk [vmem:[#allocation3] sm:$0x3] %vm55_vm2, %v266_v13 }
 0x3ce   :  { %v433_v14 = vld [vmem:[#allocation3] sm:$0x3] }
 0x3cf   :  { %512 = vrcp.f32 %v433_v14 }
 0x3dc   :  { %v513_v15 = vpop.eup %512 }
 0x3dd   :  { %438 = vperm.xlu1 %500, %v513_v15  }
 0x3f8   :  { %v338_v16 = vpop.f32.mrf.mxu1 }
 0x3fa   :  { %v485_v17 = vpop.f32.mrf.mxu1 }
 0x3fc   :  { %v410_v19 = vpop.f32.mrf.mxu1 }
 0x3fd   :  { %v423_v20 = vrot.slane %v410_v19, 7 }
 0x3fe   :  { %v490_v22 = vpop.f32.mrf.mxu1 }
 0x3ff   :  { %v424_v23 = vsel %vm212_vm3, %v423_v20, %v338_v16 }
 0x400   :  { %v426_v24 = vadd.f32 %v424_v23, %v420_v21 }
 0x402   :  { %428 = vst.msk [vmem:[#allocation4] sm:$0x3] %vm58_vm5, %v426_v24 }
 0x409   :  { %v435_v25 = vld [vmem:[#allocation4] sm:$0x3] }
 0x458   :  { %v439_v26 = vpop.permute.xlu1 %438 }
 0x459   :  { %v441_v27 = vmul.f32 %v439_v26, %v435_v25 }
 0x45b   :  { %442 = vst.msk [vmem:[#allocation11] sm:$0x3] %vm58_vm5, %v441_v27 }
 0x45c   :  { %565 = shalt.err (!%p562_p0)
}
 0x45d   :  { %452 = dma.vmem_to_hbm [thread:$0]  %s450_s7, 32, %s664_s5, [#allocation8]  }
 0x45e   :  { %578 = dma.done.wait [#allocation8], 32  }
 0x45f   :  { %579 = vsyncadd [#allocation8], 4294967264 }
 0x460   :  { %456 = vsyncpa [#allocation7], 1 }
 0x461   :  { %457 = vsyncpa [#allocation10], 1 }
 0x462   :  { %458 = vsyncpa [#allocation8], 1 }

</bundles_post_ra>
